<compile_context>
chip_gen: v6e
topology: v6e:2x2x1
jax: 0.10.0
libtpu: 0.0.40
codegen_flags: <defaults>
</compile_context>

<pallas_src>
import jax
import jax.numpy as jnp
from jax.experimental import pallas as pl
from jax.experimental.pallas import tpu as pltpu


def _round_up(n, m):
    return ((n + m - 1) // m) * m


def _classification_net_kernel(x_ref, w1_ref, b1_ref, w2_ref, out_ref):
    # x_ref:  (TB, C)   f32   (cast to bf16 on the VPU; compute has huge slack)
    # w1_ref: (C,  Hp)  bf16  (PyTorch fc1.weight.T, zero-padded to Hp)
    # b1_ref: (1,  Hp)  f32
    # w2_ref: (Hp, S)   bf16  (PyTorch slot_projection.weight.T, zero-pad rows only)
    # out_ref:(TB, S)   f32
    x = x_ref[...].astype(jnp.bfloat16)
    h = jnp.dot(x, w1_ref[...], preferred_element_type=jnp.float32)
    h = jnp.maximum(h + b1_ref[...], 0.0)            # bias + ReLU in f32
    # Dropout: inference-mode identity.
    out_ref[...] = jnp.dot(h.astype(jnp.bfloat16), w2_ref[...],
                           preferred_element_type=jnp.float32).astype(out_ref.dtype)


def prepare_classification_net_params(w1_t, b1, w2_t):
    """One-time (model-init) weight prep: pad hidden dim to 128, cast matmul
    operands to bf16.  Hoisted out of the per-call path.

      w1_t: (context_dim, hidden_dim)  = fc1.weight.T
      b1:   (hidden_dim,)              = fc1.bias
      w2_t: (hidden_dim, num_slots)    = slot_projection.weight.T
    """
    C, H = w1_t.shape
    S = w2_t.shape[1]
    Hp = _round_up(H, 128)   # lane-dense intermediate; zero cols stay zero
    w1_p = jnp.pad(w1_t, ((0, 0), (0, Hp - H))).astype(jnp.bfloat16)
    b1_p = jnp.pad(b1, (0, Hp - H)).reshape(1, Hp).astype(jnp.float32)
    w2_p = jnp.pad(w2_t, ((0, Hp - H), (0, 0))).astype(jnp.bfloat16)  # (Hp, S)
    return w1_p, b1_p, w2_p


def _min_grid_steps():
    """>=2 grid steps only where a chip has multiple TensorCores (v7x/megacore);
    on v5e/v6e the grid is a serial loop, so fewer steps = less fixed overhead."""
    try:
        kind = jax.devices()[0].device_kind.lower()
    except Exception:  # pragma: no cover - be robust to odd environments
        kind = ""
    return 2 if ("v7" in kind or "7x" in kind) else 1


def _pick_batch_tile(B, block_b, min_steps):
    """Pick a batch tile that is a multiple of 16 (sublane safe), gives at
    least `min_steps` grid steps, and stays <= block_b rows per step."""
    b16 = _round_up(max(B, 1), 16)
    if b16 <= block_b * min_steps:
        # Small/medium batch: exactly min_steps tiles (1 on v5e/v6e, 2 on v7x).
        tb = _round_up(-(-b16 // min_steps), 16)
    else:
        tb = _round_up(block_b, 16)
    Bp = _round_up(B, tb)
    return tb, Bp


def classification_net_forward(x, w1_p, b1_p, w2_p, *, block_b=1024):
    """x: (B, context_dim) f32; (w1_p, b1_p, w2_p) from
    prepare_classification_net_params.  Returns (B, num_slots) f32."""
    B, C = x.shape
    Hp = w1_p.shape[1]
    S = w2_p.shape[1]

    tb, Bp = _pick_batch_tile(B, block_b, _min_grid_steps())
    x_in = x if Bp == B else jnp.pad(x, ((0, Bp - B), (0, 0)))

    grid = (pl.cdiv(Bp, tb),)

    out = pl.pallas_call(
        _classification_net_kernel,
        out_shape=jax.ShapeDtypeStruct((Bp, S), jnp.float32),
        grid=grid,
        in_specs=[
            pl.BlockSpec((tb, C), lambda i: (i, 0)),   # x tile streams over grid
            pl.BlockSpec((C, Hp), lambda i: (0, 0)),   # weights resident in VMEM
            pl.BlockSpec((1, Hp), lambda i: (0, 0)),
            pl.BlockSpec((Hp, S), lambda i: (0, 0)),
        ],
        out_specs=pl.BlockSpec((tb, S), lambda i: (i, 0)),
        compiler_params=pltpu.CompilerParams(
            dimension_semantics=("parallel",)),        # megacore-shardable on v7x
    )(x_in, w1_p, b1_p, w2_p)

    # Padded batch rows compute relu(b1) @ W2 (garbage); slice them off.
    return out if Bp == B else out[:B]


if __name__ == "__main__":
    # Small shapes consistent with the module's forward.
    batch = 256
    context_dim = 32      # embedding size
    hidden_dim = 64       # fc_dim
    num_slots = 8
    # dropout_prob irrelevant at inference (identity)

    key = jax.random.PRNGKey(0)
    kx, kw1, kb1, kw2 = jax.random.split(key, 4)

    x = jax.random.normal(kx, (batch, context_dim), dtype=jnp.float32)
    w1_t = jax.random.normal(kw1, (context_dim, hidden_dim), dtype=jnp.float32) * 0.1
    b1 = jax.random.normal(kb1, (hidden_dim,), dtype=jnp.float32) * 0.1
    w2_t = jax.random.normal(kw2, (hidden_dim, num_slots), dtype=jnp.float32) * 0.1

    # One-time weight prep (hoisted out of the per-call path).
    w1_p, b1_p, w2_p = prepare_classification_net_params(w1_t, b1, w2_t)

    fwd = jax.jit(classification_net_forward, static_argnames=("block_b",))
    out = fwd(x, w1_p, b1_p, w2_p, block_b=1024)
    out = jax.block_until_ready(out)

    # Reference in plain JAX (f32). bf16 matmul operands -> relaxed tolerance.
    ref = jnp.maximum(x @ w1_t + b1, 0.0) @ w2_t
    assert out.shape == (batch, num_slots)
    assert jnp.allclose(out, ref, atol=1e-2, rtol=1e-2), float(jnp.max(jnp.abs(out - ref)))

    print("KERNEL_OK")
</pallas_src>

<mosaic_0001>
module attributes {stable_mosaic.version = 11 : i64} {
  func.func @_classification_net_kernel(%arg0: i32, %arg1: memref<256x32xf32, #tpu.memory_space<vmem>>, %arg2: memref<32x128xbf16, #tpu.memory_space<vmem>>, %arg3: memref<1x128xf32, #tpu.memory_space<vmem>>, %arg4: memref<128x8xbf16, #tpu.memory_space<vmem>>, %arg5: memref<256x8xf32, #tpu.memory_space<vmem>>) attributes {dimension_semantics = [#tpu.dimension_semantics<parallel>], iteration_bounds = array<i64: 1>, scalar_prefetch = 0 : i64, scratch_operands = 0 : i64, tpu.core_type = #tpu.core_type<tc>, window_params = [{transform_indices = @transform_0, window_bounds = array<i64: 256, 32>}, {pipeline_mode = #tpu.pipeline_mode<synchronous>, transform_indices = @transform_1, window_bounds = array<i64: 32, 128>}, {pipeline_mode = #tpu.pipeline_mode<synchronous>, transform_indices = @transform_2, window_bounds = array<i64: 1, 128>}, {pipeline_mode = #tpu.pipeline_mode<synchronous>, transform_indices = @transform_3, window_bounds = array<i64: 128, 8>}, {transform_indices = @transform_4, window_bounds = array<i64: 256, 8>}]} {
    %c0 = arith.constant 0 : index
    %c0_0 = arith.constant 0 : index
    %0 = vector.load %arg1[%c0, %c0_0] : memref<256x32xf32, #tpu.memory_space<vmem>>, vector<256x32xf32>
    %1 = arith.truncf %0 : vector<256x32xf32> to vector<256x32xbf16>
    %c0_1 = arith.constant 0 : index
    %c0_2 = arith.constant 0 : index
    %2 = vector.load %arg2[%c0_1, %c0_2] : memref<32x128xbf16, #tpu.memory_space<vmem>>, vector<32x128xbf16>
    %cst = arith.constant dense<0.000000e+00> : vector<256x128xf32>
    %3 = tpu.matmul %1, %2, %cst {dimension_numbers = #tpu.dot_dimension_numbers<[1], [0], [0], [1], [0, 0, 1, 1], [], []>} : vector<256x32xbf16>, vector<32x128xbf16>, vector<256x128xf32> -> vector<256x128xf32>
    %c0_3 = arith.constant 0 : index
    %c0_4 = arith.constant 0 : index
    %4 = vector.load %arg3[%c0_3, %c0_4] : memref<1x128xf32, #tpu.memory_space<vmem>>, vector<1x128xf32>
    %5 = vector.broadcast %4 : vector<1x128xf32> to vector<256x128xf32>
    %6 = arith.addf %3, %5 : vector<256x128xf32>
    %cst_5 = arith.constant 0.000000e+00 : f32
    %7 = vector.broadcast %cst_5 : f32 to vector<256x128xf32>
    %8 = arith.maximumf %6, %7 : vector<256x128xf32>
    %9 = arith.truncf %8 : vector<256x128xf32> to vector<256x128xbf16>
    %c0_6 = arith.constant 0 : index
    %c0_7 = arith.constant 0 : index
    %10 = vector.load %arg4[%c0_6, %c0_7] : memref<128x8xbf16, #tpu.memory_space<vmem>>, vector<128x8xbf16>
    %cst_8 = arith.constant dense<0.000000e+00> : vector<256x8xf32>
    %11 = tpu.matmul %9, %10, %cst_8 {dimension_numbers = #tpu.dot_dimension_numbers<[1], [0], [0], [1], [0, 0, 1, 1], [], []>} : vector<256x128xbf16>, vector<128x8xbf16>, vector<256x8xf32> -> vector<256x8xf32>
    %c0_9 = arith.constant 0 : index
    %c0_10 = arith.constant 0 : index
    %12 = vector.load %arg5[%c0_9, %c0_10] : memref<256x8xf32, #tpu.memory_space<vmem>>, vector<256x8xf32>
    tpu.vector_store %arg5[%c0_9, %c0_10], %11 {strides = array<i32>} : memref<256x8xf32, #tpu.memory_space<vmem>>, vector<256x8xf32>,
    return
  }
  func.func @transform_0(%arg0: i32) -> (i32, i32) {
    %c0_i32 = arith.constant 0 : i32
    %c0_i32_0 = arith.constant 0 : i32
    return %arg0, %c0_i32 : i32, i32
  }
  func.func @transform_1(%arg0: i32) -> (i32, i32) {
    %c0_i32 = arith.constant 0 : i32
    %c0_i32_0 = arith.constant 0 : i32
    %c0_i32_1 = arith.constant 0 : i32
    return %c0_i32, %c0_i32_0 : i32, i32
  }
  func.func @transform_2(%arg0: i32) -> (i32, i32) {
    %c0_i32 = arith.constant 0 : i32
    %c0_i32_0 = arith.constant 0 : i32
    %c0_i32_1 = arith.constant 0 : i32
    return %c0_i32, %c0_i32_0 : i32, i32
  }
  func.func @transform_3(%arg0: i32) -> (i32, i32) {
    %c0_i32 = arith.constant 0 : i32
    %c0_i32_0 = arith.constant 0 : i32
    %c0_i32_1 = arith.constant 0 : i32
    return %c0_i32, %c0_i32_0 : i32, i32
  }
  func.func @transform_4(%arg0: i32) -> (i32, i32) {
    %c0_i32 = arith.constant 0 : i32
    %c0_i32_0 = arith.constant 0 : i32
    return %arg0, %c0_i32 : i32, i32
  }
}

</mosaic_0001>

<bundles_post_ra>
// kernel: classification_net_forward.1
= control target key start
LH: loop header
LB: loop body
LE: loop exit
PB: predicated region body
PF: predicated region fallthrough
CT: control target
= control target key end

     0   :  { %vm89_vm0 = vcmask 261120   ;;  %vm572_vm1 = vcmask 64512   ;;  %s1120_s1 = inlined_call_operand.vmem [shape: bf16[32,128], index: 1, kind: input, shape index: {}]   ;;  %s1121_s0 = inlined_call_operand.vmem [shape: f32[256,32], index: 0, kind: input, shape index: {}]   ;;  %s1122_s3 = inlined_call_operand.vmem [shape: bf16[128,8], index: 3, kind: input, shape index: {}]   ;;  %s1123_s2 = inlined_call_operand.vmem [shape: f32[1,128], index: 2, kind: input, shape index: {}]   ;;  %s1124_s4 = inlined_call_operand.vmem [shape: f32[256,8], index: 4, kind: output, shape index: {}]  }
   0x1   :  { %v778_v0 = vld [vmem:[%s1120_s1 + $0x8] sm:$0xff]   ;;  %v779_v1 = vld [vmem:[%s1120_s1] sm:$0xff]   ;;  %v20_v5 = vld [vmem:[%s1121_s0 + $0x10] sm:$0xff] }
   0x2   :  { %678 = vmatprep.subr.bf16.mxu0 %v778_v0  ;;  %v18_v2 = vld [vmem:[%s1121_s0] sm:$0xff]  ;;  %v19_v3 = vld [vmem:[%s1121_s0 + $0x8] sm:$0xff]  ;;  %v21_v6 = vld [vmem:[%s1121_s0 + $0x18] sm:$0xff] }
   0x3   :  { %679 = vmatpush3.bf16.msra.mxu0 %v778_v0  ;;  %v50_v4 = vpack.c.bf16 %v19_v3, %v18_v2  ;;  %v22_v7 = vld [vmem:[%s1121_s0 + $0x20] sm:$0xff]  ;;  %v23_v8 = vld [vmem:[%s1121_s0 + $0x28] sm:$0xff]  ;;  %v51_v9 = vpack.c.bf16 %v21_v6, %v20_v5  ;;  %v24_v11 = vld [vmem:[%s1121_s0 + $0x30] sm:$0xff] }
   0x4   :  { %680 = vmatprep.subr.bf16.mxu0 %v779_v1  ;;  %v52_v10 = vpack.c.bf16 %v23_v8, %v22_v7  ;;  %v25_v12 = vld [vmem:[%s1121_s0 + $0x38] sm:$0xff]  ;;  %v26_v13 = vld [vmem:[%s1121_s0 + $0x40] sm:$0xff]  ;;  %v27_v14 = vld [vmem:[%s1121_s0 + $0x48] sm:$0xff] }
   0x5   :  { %682 = vmatprep.mubr.msk.bf16.mxu0 %vm89_vm0, %v50_v4  ;;  %v780_v15 = vld [vmem:[%s1122_s3 + $0x38] sm:$0xff]   ;;  %v53_v16 = vpack.c.bf16 %v25_v12, %v24_v11  ;;  %v781_v17 = vld [vmem:[%s1122_s3 + $0x30] sm:$0xff]   ;;  %v54_v18 = vpack.c.bf16 %v27_v14, %v26_v13  ;;  %v782_v20 = vld [vmem:[%s1122_s3 + $0x28] sm:$0xff]  }
   0x6   :  { %762 = vmatprep.subr.bf16.mxu1 %v780_v15  ;;  %v28_v19 = vld [vmem:[%s1121_s0 + $0x50] sm:$0xff]  ;;  %v29_v21 = vld [vmem:[%s1121_s0 + $0x58] sm:$0xff]  ;;  %v30_v22 = vld [vmem:[%s1121_s0 + $0x60] sm:$0xff] }
   0x7   :  { %681 = vmatpush3.bf16.msra.mxu0 %v779_v1  ;;  %770 = vmatpush3.bf16.msra.mxu1 %v780_v15  ;;  %v31_v23 = vld [vmem:[%s1121_s0 + $0x68] sm:$0xff]  ;;  %v783_v24 = vld [vmem:[%s1122_s3 + $0x20] sm:$0xff]   ;;  %v55_v25 = vpack.c.bf16 %v29_v21, %v28_v19  ;;  %v784_v27 = vld [vmem:[%s1122_s3 + $0x18] sm:$0xff]  }
   0x8   :  { %714 = vmatprep.subr.bf16.mxu0 %v780_v15  ;;  %763 = vmatprep.subr.bf16.mxu1 %v781_v17  ;;  %v56_v26 = vpack.c.bf16 %v31_v23, %v30_v22  ;;  %v32_v28 = vld [vmem:[%s1121_s0 + $0x70] sm:$0xff]  ;;  %v33_v29 = vld [vmem:[%s1121_s0 + $0x78] sm:$0xff]  ;;  %v34_v30 = vld [vmem:[%s1121_s0 + $0x80] sm:$0xff] }
   0x9   :  { %v35_v31 = vld [vmem:[%s1121_s0 + $0x88] sm:$0xff]  ;;  %v57_v32 = vpack.c.bf16 %v33_v29, %v32_v28  ;;  %v36_v34 = vld [vmem:[%s1121_s0 + $0x90] sm:$0xff]  ;;  %v37_v35 = vld [vmem:[%s1121_s0 + $0x98] sm:$0xff] }
   0xa   :  { %683 = vmatmul.mubr.msk.bf16.vlgmr.msra.gmra.mxu0 %vm89_vm0, %v51_v9  ;;  %v58_v33 = vpack.c.bf16 %v35_v31, %v34_v30  ;;  %v38_v36 = vld [vmem:[%s1121_s0 + $0xa0] sm:$0xff]  ;;  %v39_v37 = vld [vmem:[%s1121_s0 + $0xa8] sm:$0xff]  ;;  %v59_v38 = vpack.c.bf16 %v37_v35, %v36_v34  ;;  %v40_v40 = vld [vmem:[%s1121_s0 + $0xb0] sm:$0xff] }
   0xb   :  { %686 = vmatprep.mubr.msk.bf16.mxu0 %vm89_vm0, %v52_v10  ;;  %715 = vmatpush3.bf16.msra.mxu0 %v780_v15  ;;  %v60_v39 = vpack.c.bf16 %v39_v37, %v38_v36  ;;  %v41_v41 = vld [vmem:[%s1121_s0 + $0xb8] sm:$0xff]  ;;  %v42_v42 = vld [vmem:[%s1121_s0 + $0xc0] sm:$0xff]  ;;  %v43_v43 = vld [vmem:[%s1121_s0 + $0xc8] sm:$0xff] }
   0xc   :  { %716 = vmatprep.subr.bf16.mxu0 %v781_v17  ;;  %771 = vmatpush3.bf16.msra.mxu1 %v781_v17  ;;  %v61_v44 = vpack.c.bf16 %v41_v41, %v40_v40  ;;  %v62_v45 = vpack.c.bf16 %v43_v43, %v42_v42  ;;  %v44_v46 = vld [vmem:[%s1121_s0 + $0xd0] sm:$0xff]  ;;  %v45_v47 = vld [vmem:[%s1121_s0 + $0xd8] sm:$0xff]  ;;  %v46_v48 = vld [vmem:[%s1121_s0 + $0xe0] sm:$0xff] }
   0xd   :  { %764 = vmatprep.subr.bf16.mxu1 %v782_v20  ;;  %v47_v49 = vld [vmem:[%s1121_s0 + $0xe8] sm:$0xff]  ;;  %v63_v50 = vpack.c.bf16 %v45_v47, %v44_v46  ;;  %v48_v52 = vld [vmem:[%s1121_s0 + $0xf0] sm:$0xff]  ;;  %v49_v53 = vld [vmem:[%s1121_s0 + $0xf8] sm:$0xff] }
   0xe   :  { %v64_v51 = vpack.c.bf16 %v47_v49, %v46_v48  ;;  %v65_v54 = vpack.c.bf16 %v49_v53, %v48_v52  ;;  %v785_v55 = vld [vmem:[%s1122_s3 + $0x10] sm:$0xff]   ;;  %v786_v56 = vld [vmem:[%s1122_s3 + $0x8] sm:$0xff]   ;;  %v787_v57 = vld [vmem:[%s1122_s3] sm:$0xff]  }
   0xf   :  { %717 = vmatpush3.bf16.msra.mxu0 %v781_v17  ;;  %v958_v60 = vld [vmem:[%s1123_s2] ss:$0 sm:$0xff] }
  0x10   :  { %718 = vmatprep.subr.bf16.mxu0 %v782_v20  ;;  %772 = vmatpush3.bf16.msra.mxu1 %v782_v20 }
  0x11   :  { %765 = vmatprep.subr.bf16.mxu1 %v783_v24 }
  0x12   :  { %687 = vmatmul.mubr.msk.bf16.gmra.mxu0 %vm89_vm0, %v53_v16 }
  0x13   :  { %690 = vmatprep.mubr.msk.bf16.mxu0 %vm89_vm0, %v54_v18  ;;  %719 = vmatpush3.bf16.msra.mxu0 %v782_v20 }
  0x14   :  { %720 = vmatprep.subr.bf16.mxu0 %v783_v24  ;;  %773 = vmatpush3.bf16.msra.mxu1 %v783_v24 }
  0x15   :  { %766 = vmatprep.subr.bf16.mxu1 %v784_v27 }
  0x17   :  { %721 = vmatpush3.bf16.msra.mxu0 %v783_v24 }
  0x18   :  { %722 = vmatprep.subr.bf16.mxu0 %v784_v27  ;;  %774 = vmatpush3.bf16.msra.mxu1 %v784_v27 }
  0x19   :  { %767 = vmatprep.subr.bf16.mxu1 %v785_v55 }
  0x1a   :  { %691 = vmatmul.mubr.msk.bf16.gmra.mxu0 %vm89_vm0, %v55_v25 }
  0x1b   :  { %694 = vmatprep.mubr.msk.bf16.mxu0 %vm89_vm0, %v56_v26  ;;  %723 = vmatpush3.bf16.msra.mxu0 %v784_v27 }
  0x1c   :  { %724 = vmatprep.subr.bf16.mxu0 %v785_v55  ;;  %775 = vmatpush3.bf16.msra.mxu1 %v785_v55 }
  0x1d   :  { %768 = vmatprep.subr.bf16.mxu1 %v786_v56 }
  0x1f   :  { %725 = vmatpush3.bf16.msra.mxu0 %v785_v55 }
  0x20   :  { %726 = vmatprep.subr.bf16.mxu0 %v786_v56  ;;  %776 = vmatpush3.bf16.msra.mxu1 %v786_v56 }
  0x21   :  { %769 = vmatprep.subr.bf16.mxu1 %v787_v57 }
  0x22   :  { %695 = vmatmul.mubr.msk.bf16.gmra.mxu0 %vm89_vm0, %v57_v32 }
  0x23   :  { %698 = vmatprep.mubr.msk.bf16.mxu0 %vm89_vm0, %v58_v33  ;;  %727 = vmatpush3.bf16.msra.mxu0 %v786_v56 }
  0x24   :  { %728 = vmatprep.subr.bf16.mxu0 %v787_v57  ;;  %777 = vmatpush3.bf16.msra.mxu1 %v787_v57 }
  0x27   :  { %729 = vmatpush3.bf16.msra.mxu0 %v787_v57 }
  0x2a   :  { %699 = vmatmul.mubr.msk.bf16.gmra.mxu0 %vm89_vm0, %v59_v38 }
  0x2b   :  { %702 = vmatprep.mubr.msk.bf16.mxu0 %vm89_vm0, %v60_v39 }
  0x32   :  { %703 = vmatmul.mubr.msk.bf16.gmra.mxu0 %vm89_vm0, %v61_v44 }
  0x33   :  { %706 = vmatprep.mubr.msk.bf16.mxu0 %vm89_vm0, %v62_v45 }
  0x3a   :  { %707 = vmatmul.mubr.msk.bf16.gmra.mxu0 %vm89_vm0, %v63_v50 }
  0x3b   :  { %710 = vmatprep.mubr.msk.bf16.mxu0 %vm89_vm0, %v64_v51 }
  0x42   :  { %711 = vmatmul.mubr.msk.bf16.gmra.mxu0 %vm89_vm0, %v65_v54 }
  0xca   :  { %v684_v58 = vpop.f32.mrf.mxu0 }
  0xcb   :  { %v181_v0 = vadd.f32 %v684_v58, %v958_v60 }
  0xcc   :  { %v172_v59 = vpop.f32.mrf.mxu0 }
  0xcd   :  { %v173_v62 = vadd.f32 %v958_v60, %v172_v59  ;;  %v301_v7 = vmax.f32 %v181_v0, 0.0 }
  0xce   :  { %v685_v61 = vpop.f32.mrf.mxu0 }
  0xcf   :  { %v184_v63 = vadd.f32 %v685_v61, %v958_v60  ;;  %v299_v5 = vmax.f32 %v173_v62, 0.0 }
  0xd0   :  { %v175_v1 = vpop.f32.mrf.mxu0 }
  0xd1   :  { %v176_v2 = vadd.f32 %v958_v60, %v175_v1  ;;  %v302_v3 = vmax.f32 %v184_v63, 0.0 }
  0xd2   :  { %v688_v4 = vpop.f32.mrf.mxu0 }
  0xd3   :  { %v300_v6 = vmax.f32 %v176_v2, 0.0  ;;  %v332_v10 = vpack.c.bf16 %v302_v3, %v301_v7  ;;  %v197_v14 = vadd.f32 %v688_v4, %v958_v60 }
  0xd4   :  { %v188_v8 = vpop.f32.mrf.mxu0 }
  0xd5   :  { %v331_v9 = vpack.c.bf16 %v300_v6, %v299_v5  ;;  %v189_v12 = vadd.f32 %v958_v60, %v188_v8  ;;  %v305_v21 = vmax.f32 %v197_v14, 0.0 }
  0xd6   :  { %v689_v11 = vpop.f32.mrf.mxu0 }
  0xd7   :  { %v200_v13 = vadd.f32 %v689_v11, %v958_v60  ;;  %730 = vmatprep.mubr.bf16.mxu0 %v331_v9  ;;  %v303_v19 = vmax.f32 %v189_v12, 0.0 }
  0xd8   :  { %v191_v15 = vpop.f32.mrf.mxu0  ;;  %731 = vmatmul.mubr.bf16.vlgmr.msra.gmra.mxu0 %v332_v10 }
  0xd9   :  { %v192_v16 = vadd.f32 %v958_v60, %v191_v15  ;;  %v306_v17 = vmax.f32 %v200_v13, 0.0 }
  0xda   :  { %v692_v18 = vpop.f32.mrf.mxu0 }
  0xdb   :  { %v304_v20 = vmax.f32 %v192_v16, 0.0  ;;  %v334_v24 = vpack.c.bf16 %v306_v17, %v305_v21  ;;  %v213_v28 = vadd.f32 %v692_v18, %v958_v60 }
  0xdc   :  { %v204_v22 = vpop.f32.mrf.mxu0 }
  0xdd   :  { %v333_v23 = vpack.c.bf16 %v304_v20, %v303_v19  ;;  %v205_v26 = vadd.f32 %v958_v60, %v204_v22  ;;  %v309_v35 = vmax.f32 %v213_v28, 0.0 }
  0xde   :  { %v693_v25 = vpop.f32.mrf.mxu0 }
  0xdf   :  { %v216_v27 = vadd.f32 %v693_v25, %v958_v60  ;;  %734 = vmatprep.mubr.bf16.mxu1 %v333_v23  ;;  %v307_v33 = vmax.f32 %v205_v26, 0.0 }
  0xe0   :  { %v207_v29 = vpop.f32.mrf.mxu0  ;;  %735 = vmatmul.mubr.bf16.vlgmr.msra.gmra.mxu1 %v334_v24 }
  0xe1   :  { %v208_v30 = vadd.f32 %v958_v60, %v207_v29  ;;  %v310_v31 = vmax.f32 %v216_v27, 0.0 }
  0xe2   :  { %v696_v32 = vpop.f32.mrf.mxu0 }
  0xe3   :  { %v308_v34 = vmax.f32 %v208_v30, 0.0  ;;  %v336_v38 = vpack.c.bf16 %v310_v31, %v309_v35  ;;  %v229_v42 = vadd.f32 %v696_v32, %v958_v60 }
  0xe4   :  { %v220_v36 = vpop.f32.mrf.mxu0 }
  0xe5   :  { %v335_v37 = vpack.c.bf16 %v308_v34, %v307_v33  ;;  %v221_v40 = vadd.f32 %v958_v60, %v220_v36  ;;  %v313_v49 = vmax.f32 %v229_v42, 0.0 }
  0xe6   :  { %v697_v39 = vpop.f32.mrf.mxu0 }
  0xe7   :  { %v232_v41 = vadd.f32 %v697_v39, %v958_v60  ;;  %738 = vmatprep.mubr.bf16.mxu1 %v335_v37  ;;  %v311_v47 = vmax.f32 %v221_v40, 0.0 }
  0xe8   :  { %v223_v43 = vpop.f32.mrf.mxu0  ;;  %739 = vmatmul.mubr.bf16.gmra.mxu1 %v336_v38 }
  0xe9   :  { %v224_v44 = vadd.f32 %v958_v60, %v223_v43  ;;  %v314_v45 = vmax.f32 %v232_v41, 0.0 }
  0xea   :  { %v700_v46 = vpop.f32.mrf.mxu0 }
  0xeb   :  { %v312_v48 = vmax.f32 %v224_v44, 0.0  ;;  %v338_v52 = vpack.c.bf16 %v314_v45, %v313_v49  ;;  %v245_v56 = vadd.f32 %v700_v46, %v958_v60 }
  0xec   :  { %v236_v50 = vpop.f32.mrf.mxu0 }
  0xed   :  { %v337_v51 = vpack.c.bf16 %v312_v48, %v311_v47  ;;  %v237_v54 = vadd.f32 %v958_v60, %v236_v50  ;;  %v317_v0 = vmax.f32 %v245_v56, 0.0 }
  0xee   :  { %v701_v53 = vpop.f32.mrf.mxu0 }
  0xef   :  { %v248_v55 = vadd.f32 %v701_v53, %v958_v60  ;;  %742 = vmatprep.mubr.bf16.mxu1 %v337_v51  ;;  %v315_v62 = vmax.f32 %v237_v54, 0.0 }
  0xf0   :  { %v239_v57 = vpop.f32.mrf.mxu0  ;;  %743 = vmatmul.mubr.bf16.gmra.mxu1 %v338_v52 }
  0xf1   :  { %v240_v58 = vadd.f32 %v958_v60, %v239_v57  ;;  %v318_v59 = vmax.f32 %v248_v55, 0.0 }
  0xf2   :  { %v704_v61 = vpop.f32.mrf.mxu0 }
  0xf3   :  { %v316_v63 = vmax.f32 %v240_v58, 0.0  ;;  %v340_v3 = vpack.c.bf16 %v318_v59, %v317_v0  ;;  %v261_v7 = vadd.f32 %v704_v61, %v958_v60 }
  0xf4   :  { %v252_v1 = vpop.f32.mrf.mxu0 }
  0xf5   :  { %v339_v2 = vpack.c.bf16 %v316_v63, %v315_v62  ;;  %v253_v5 = vadd.f32 %v958_v60, %v252_v1  ;;  %v321_v14 = vmax.f32 %v261_v7, 0.0 }
  0xf6   :  { %v705_v4 = vpop.f32.mrf.mxu0 }
  0xf7   :  { %v264_v6 = vadd.f32 %v705_v4, %v958_v60  ;;  %746 = vmatprep.mubr.bf16.mxu1 %v339_v2  ;;  %v319_v12 = vmax.f32 %v253_v5, 0.0 }
  0xf8   :  { %v255_v8 = vpop.f32.mrf.mxu0  ;;  %747 = vmatmul.mubr.bf16.gmra.mxu1 %v340_v3 }
  0xf9   :  { %v256_v9 = vadd.f32 %v958_v60, %v255_v8  ;;  %v322_v10 = vmax.f32 %v264_v6, 0.0 }
  0xfa   :  { %v708_v11 = vpop.f32.mrf.mxu0 }
  0xfb   :  { %v320_v13 = vmax.f32 %v256_v9, 0.0  ;;  %v342_v17 = vpack.c.bf16 %v322_v10, %v321_v14  ;;  %v277_v21 = vadd.f32 %v708_v11, %v958_v60 }
  0xfc   :  { %v268_v15 = vpop.f32.mrf.mxu0 }
  0xfd   :  { %v341_v16 = vpack.c.bf16 %v320_v13, %v319_v12  ;;  %v269_v19 = vadd.f32 %v958_v60, %v268_v15  ;;  %v325_v28 = vmax.f32 %v277_v21, 0.0 }
  0xfe   :  { %v709_v18 = vpop.f32.mrf.mxu0 }
  0xff   :  { %v280_v20 = vadd.f32 %v709_v18, %v958_v60  ;;  %750 = vmatprep.mubr.bf16.mxu1 %v341_v16  ;;  %v323_v26 = vmax.f32 %v269_v19, 0.0 }
 0x100   :  { %v271_v22 = vpop.f32.mrf.mxu0  ;;  %751 = vmatmul.mubr.bf16.gmra.mxu1 %v342_v17 }
 0x101   :  { %v272_v23 = vadd.f32 %v958_v60, %v271_v22  ;;  %v326_v24 = vmax.f32 %v280_v20, 0.0 }
 0x102   :  { %v712_v25 = vpop.f32.mrf.mxu0 }
 0x103   :  { %v324_v27 = vmax.f32 %v272_v23, 0.0  ;;  %v344_v31 = vpack.c.bf16 %v326_v24, %v325_v28  ;;  %v293_v35 = vadd.f32 %v712_v25, %v958_v60 }
 0x104   :  { %v284_v29 = vpop.f32.mrf.mxu0 }
 0x105   :  { %v343_v30 = vpack.c.bf16 %v324_v27, %v323_v26  ;;  %v285_v33 = vadd.f32 %v958_v60, %v284_v29  ;;  %v329_v41 = vmax.f32 %v293_v35, 0.0 }
 0x106   :  { %v713_v32 = vpop.f32.mrf.mxu0 }
 0x107   :  { %v296_v34 = vadd.f32 %v713_v32, %v958_v60  ;;  %754 = vmatprep.mubr.bf16.mxu1 %v343_v30  ;;  %v327_v39 = vmax.f32 %v285_v33, 0.0 }
 0x108   :  { %v287_v36 = vpop.f32.mrf.mxu0  ;;  %755 = vmatmul.mubr.bf16.gmra.mxu1 %v344_v31 }
 0x109   :  { %v288_v37 = vadd.f32 %v958_v60, %v287_v36  ;;  %v330_v38 = vmax.f32 %v296_v34, 0.0 }
 0x10b   :  { %v328_v40 = vmax.f32 %v288_v37, 0.0  ;;  %v346_v43 = vpack.c.bf16 %v330_v38, %v329_v41 }
 0x10d   :  { %v345_v42 = vpack.c.bf16 %v328_v40, %v327_v39 }
 0x10f   :  { %758 = vmatprep.mubr.bf16.mxu1 %v345_v42 }
 0x110   :  { %759 = vmatmul.mubr.bf16.gmra.mxu1 %v346_v43 }
 0x198   :  { %v732_v44 = vpop.f32.mrf.mxu0 }
 0x199   :  { %575 = vst.msk [vmem:[%s1124_s4 + $0x10] sm:$0xff] %vm572_vm1, %v732_v44 }
 0x19a   :  { %v445_v45 = vpop.f32.mrf.mxu0 }
 0x19b   :  { %573 = vst.msk [vmem:[%s1124_s4] sm:$0xff] %vm572_vm1, %v445_v45 }
 0x19c   :  { %v733_v60 = vpop.f32.mrf.mxu0 }
 0x19d   :  { %576 = vst.msk [vmem:[%s1124_s4 + $0x18] sm:$0xff] %vm572_vm1, %v733_v60 }
 0x19e   :  { %v448_v46 = vpop.f32.mrf.mxu0 }
 0x19f   :  { %574 = vst.msk [vmem:[%s1124_s4 + $0x8] sm:$0xff] %vm572_vm1, %v448_v46 }
 0x1a0   :  { %v736_v47 = vpop.f32.mrf.mxu1 }
 0x1a1   :  { %579 = vst.msk [vmem:[%s1124_s4 + $0x30] sm:$0xff] %vm572_vm1, %v736_v47 }
 0x1a2   :  { %v461_v48 = vpop.f32.mrf.mxu1 }
 0x1a3   :  { %577 = vst.msk [vmem:[%s1124_s4 + $0x20] sm:$0xff] %vm572_vm1, %v461_v48 }
 0x1a4   :  { %v737_v49 = vpop.f32.mrf.mxu1 }
 0x1a5   :  { %580 = vst.msk [vmem:[%s1124_s4 + $0x38] sm:$0xff] %vm572_vm1, %v737_v49 }
 0x1a6   :  { %v464_v50 = vpop.f32.mrf.mxu1 }
 0x1a7   :  { %578 = vst.msk [vmem:[%s1124_s4 + $0x28] sm:$0xff] %vm572_vm1, %v464_v50 }
 0x1a8   :  { %v740_v51 = vpop.f32.mrf.mxu1 }
 0x1a9   :  { %583 = vst.msk [vmem:[%s1124_s4 + $0x50] sm:$0xff] %vm572_vm1, %v740_v51 }
 0x1aa   :  { %v477_v52 = vpop.f32.mrf.mxu1 }
 0x1ab   :  { %581 = vst.msk [vmem:[%s1124_s4 + $0x40] sm:$0xff] %vm572_vm1, %v477_v52 }
 0x1ac   :  { %v741_v53 = vpop.f32.mrf.mxu1 }
 0x1ad   :  { %584 = vst.msk [vmem:[%s1124_s4 + $0x58] sm:$0xff] %vm572_vm1, %v741_v53 }
 0x1ae   :  { %v480_v54 = vpop.f32.mrf.mxu1 }
 0x1af   :  { %582 = vst.msk [vmem:[%s1124_s4 + $0x48] sm:$0xff] %vm572_vm1, %v480_v54 }
 0x1b0   :  { %v744_v55 = vpop.f32.mrf.mxu1 }
 0x1b1   :  { %587 = vst.msk [vmem:[%s1124_s4 + $0x70] sm:$0xff] %vm572_vm1, %v744_v55 }
 0x1b2   :  { %v493_v56 = vpop.f32.mrf.mxu1 }
 0x1b3   :  { %585 = vst.msk [vmem:[%s1124_s4 + $0x60] sm:$0xff] %vm572_vm1, %v493_v56 }
 0x1b4   :  { %v745_v57 = vpop.f32.mrf.mxu1 }
 0x1b5   :  { %588 = vst.msk [vmem:[%s1124_s4 + $0x78] sm:$0xff] %vm572_vm1, %v745_v57 }
 0x1b6   :  { %v496_v58 = vpop.f32.mrf.mxu1 }
 0x1b7   :  { %586 = vst.msk [vmem:[%s1124_s4 + $0x68] sm:$0xff] %vm572_vm1, %v496_v58 }
 0x1b8   :  { %v748_v59 = vpop.f32.mrf.mxu1 }
 0x1b9   :  { %591 = vst.msk [vmem:[%s1124_s4 + $0x90] sm:$0xff] %vm572_vm1, %v748_v59 }
 0x1ba   :  { %v509_v61 = vpop.f32.mrf.mxu1 }
 0x1bb   :  { %589 = vst.msk [vmem:[%s1124_s4 + $0x80] sm:$0xff] %vm572_vm1, %v509_v61 }
 0x1bc   :  { %v749_v62 = vpop.f32.mrf.mxu1 }
 0x1bd   :  { %592 = vst.msk [vmem:[%s1124_s4 + $0x98] sm:$0xff] %vm572_vm1, %v749_v62 }
 0x1be   :  { %v512_v63 = vpop.f32.mrf.mxu1 }
 0x1bf   :  { %590 = vst.msk [vmem:[%s1124_s4 + $0x88] sm:$0xff] %vm572_vm1, %v512_v63 }
 0x1c0   :  { %v752_v0 = vpop.f32.mrf.mxu1 }
 0x1c1   :  { %595 = vst.msk [vmem:[%s1124_s4 + $0xb0] sm:$0xff] %vm572_vm1, %v752_v0 }
 0x1c2   :  { %v525_v1 = vpop.f32.mrf.mxu1 }
 0x1c3   :  { %593 = vst.msk [vmem:[%s1124_s4 + $0xa0] sm:$0xff] %vm572_vm1, %v525_v1 }
 0x1c4   :  { %v753_v2 = vpop.f32.mrf.mxu1 }
 0x1c5   :  { %596 = vst.msk [vmem:[%s1124_s4 + $0xb8] sm:$0xff] %vm572_vm1, %v753_v2 }
 0x1c6   :  { %v528_v3 = vpop.f32.mrf.mxu1 }
 0x1c7   :  { %594 = vst.msk [vmem:[%s1124_s4 + $0xa8] sm:$0xff] %vm572_vm1, %v528_v3 }
 0x1c8   :  { %v756_v4 = vpop.f32.mrf.mxu1 }
 0x1c9   :  { %599 = vst.msk [vmem:[%s1124_s4 + $0xd0] sm:$0xff] %vm572_vm1, %v756_v4 }
 0x1ca   :  { %v541_v5 = vpop.f32.mrf.mxu1 }
 0x1cb   :  { %597 = vst.msk [vmem:[%s1124_s4 + $0xc0] sm:$0xff] %vm572_vm1, %v541_v5 }
 0x1cc   :  { %v757_v6 = vpop.f32.mrf.mxu1 }
 0x1cd   :  { %600 = vst.msk [vmem:[%s1124_s4 + $0xd8] sm:$0xff] %vm572_vm1, %v757_v6 }
 0x1ce   :  { %v544_v7 = vpop.f32.mrf.mxu1 }
 0x1cf   :  { %598 = vst.msk [vmem:[%s1124_s4 + $0xc8] sm:$0xff] %vm572_vm1, %v544_v7 }
 0x1d0   :  { %v760_v8 = vpop.f32.mrf.mxu1 }
 0x1d1   :  { %603 = vst.msk [vmem:[%s1124_s4 + $0xf0] sm:$0xff] %vm572_vm1, %v760_v8 }
 0x1d2   :  { %v557_v9 = vpop.f32.mrf.mxu1 }
 0x1d3   :  { %601 = vst.msk [vmem:[%s1124_s4 + $0xe0] sm:$0xff] %vm572_vm1, %v557_v9 }
 0x1d4   :  { %v761_v10 = vpop.f32.mrf.mxu1 }
 0x1d5   :  { %604 = vst.msk [vmem:[%s1124_s4 + $0xf8] sm:$0xff] %vm572_vm1, %v761_v10 }
 0x1d6   :  { %v560_v11 = vpop.f32.mrf.mxu1 }
 0x1d7   :  { %602 = vst.msk [vmem:[%s1124_s4 + $0xe8] sm:$0xff] %vm572_vm1, %v560_v11 }

</bundles_post_ra>
